<compile_context>
chip_gen: v5e
topology: v5e:2x2
jax: 0.10.0
libtpu: 0.0.40
codegen_flags: <defaults>
</compile_context>

<pallas_src>
import functools

import jax
import jax.numpy as jnp
import numpy as np
from jax.experimental import pallas as pl
from jax.experimental.pallas import tpu as pltpu

_LANE = 128


def _choose_tiles(N, C, HW, elt_bytes, *, per_block_budget=2 * 1024 * 1024,
                  max_lanes=2048, max_n_blk=8):
    """Pick (n_blk, hw_tile, lane): lane-dense hw_tile (multiple of 128 when
    possible) and an N-block factor so one x block is ~1-2 MiB."""
    if HW < _LANE:
        hw_tile = HW            # full extent (allowed); tiny feature maps only
        lane = HW
    else:
        lanes_cap = max(_LANE,
                        (per_block_budget // (C * elt_bytes)) // _LANE * _LANE)
        hw_tile = min((HW // _LANE) * _LANE, max_lanes, lanes_cap)
        hw_tile = max(hw_tile, _LANE)
        lane = _LANE
    block_bytes = C * hw_tile * elt_bytes
    n_blk = 1
    for d in range(1, min(N, max_n_blk) + 1):
        if N % d == 0 and d * block_bytes <= per_block_budget:
            n_blk = d
    return n_blk, hw_tile, lane


def _stats_kernel(n_blk, lane, hw_tile, tail_valid,
                  xs_ref, xt_ref,
                  sum_s_ref, sq_s_ref, sum_t_ref, sq_t_ref,
                  acc_ss, acc_qs, acc_st, acc_qt):
    """Per-(N-block) partial sum / sum-of-squares for both domains.

    Grid: (N // n_blk  [parallel],  cdiv(HW, hw_tile)  [arbitrary]).
    Accumulates lane-parallel into (C, lane) f32 scratch; one cross-lane
    reduce per N-block when the HW axis finishes.
    """
    h = pl.program_id(1)
    nh = pl.num_programs(1)

    @pl.when(h == 0)
    def _():
        acc_ss[...] = jnp.zeros_like(acc_ss)
        acc_qs[...] = jnp.zeros_like(acc_qs)
        acc_st[...] = jnp.zeros_like(acc_st)
        acc_qt[...] = jnp.zeros_like(acc_qt)

    n_chunks = hw_tile // lane
    need_tail_mask = tail_valid < hw_tile     # static Python bool
    is_tail = h == nh - 1                     # traced scalar

    for j in range(n_chunks):
        lo = j * lane                         # static chunk offset
        mask_chunk = need_tail_mask and (lo + lane > tail_valid)
        if mask_chunk:
            lane_idx = jax.lax.broadcasted_iota(jnp.int32, (1, lane), 1) + lo
            valid = jnp.logical_or(jnp.logical_not(is_tail),
                                   lane_idx < tail_valid)
        for b in range(n_blk):
            # Slice the refs directly: only (C, lane) is live per step.
            cs = xs_ref[b, :, pl.ds(lo, lane)].astype(jnp.float32)
            ct = xt_ref[b, :, pl.ds(lo, lane)].astype(jnp.float32)
            if mask_chunk:
                cs = jnp.where(valid, cs, 0.0)
                ct = jnp.where(valid, ct, 0.0)
            acc_ss[...] += cs
            acc_qs[...] += cs * cs
            acc_st[...] += ct
            acc_qt[...] += ct * ct

    @pl.when(h == nh - 1)
    def _():
        # The only cross-lane reduction, once per N-block.
        sum_s_ref[...] = jnp.sum(acc_ss[...], axis=1, keepdims=True)
        sq_s_ref[...] = jnp.sum(acc_qs[...], axis=1, keepdims=True)
        sum_t_ref[...] = jnp.sum(acc_st[...], axis=1, keepdims=True)
        sq_t_ref[...] = jnp.sum(acc_qt[...], axis=1, keepdims=True)


def _affine_kernel(x_ref, scale_ref, shift_ref, o_ref):
    # One mul + one add per element; sqrt/divide/exchange already folded into
    # the (C, 1) per-channel scale/shift vectors.
    x = x_ref[...].astype(jnp.float32)
    o_ref[...] = (x * scale_ref[...] + shift_ref[...]).astype(o_ref.dtype)


def interbn_forward(x_s, x_t, params, *, threshold=0.5, momentum=0.1, eps=1e-5):
    """x_s, x_t: NCHW. Returns (out_s, out_t, new_running_stats dict)."""
    N, C, H, W = x_s.shape
    assert x_t.shape == x_s.shape and x_t.dtype == x_s.dtype
    HW = H * W
    M = N * HW
    dtype = x_s.dtype
    elt = dtype.itemsize

    n_blk, hw_tile, lane = _choose_tiles(N, C, HW, elt)
    num_nb = N // n_blk
    num_hw = pl.cdiv(HW, hw_tile)
    tail_valid = HW - (num_hw - 1) * hw_tile

    # Free reshapes only: NCHW -> (N, C, H*W). No transposes, no dtype casts.
    xs3 = x_s.reshape(N, C, HW)
    xt3 = x_t.reshape(N, C, HW)

    x_spec = pl.BlockSpec((n_blk, C, hw_tile), lambda n, h: (n, 0, h))
    part_spec = pl.BlockSpec((None, C, 1), lambda n, h: (n, 0, 0))
    part_shape = jax.ShapeDtypeStruct((num_nb, C, 1), jnp.float32)

    stats_kernel = functools.partial(_stats_kernel, n_blk, lane, hw_tile,
                                     tail_valid)
    stats_cost = pl.CostEstimate(
        flops=6 * N * C * HW, transcendentals=0,
        bytes_accessed=2 * N * C * HW * elt + 4 * num_nb * C * 4)

    psum_s, psq_s, psum_t, psq_t = pl.pallas_call(
        stats_kernel,
        out_shape=(part_shape,) * 4,
        grid=(num_nb, num_hw),
        in_specs=[x_spec, x_spec],
        out_specs=(part_spec,) * 4,
        scratch_shapes=[pltpu.VMEM((C, lane), jnp.float32)] * 4,
        compiler_params=pltpu.CompilerParams(
            dimension_semantics=("parallel", "arbitrary")),
        cost_estimate=stats_cost,
    )(xs3, xt3)

    # ---- tiny per-channel finalize (C-length vectors) in plain JAX ----
    f32 = jnp.float32
    sum_s = jnp.sum(psum_s, axis=0)[:, 0]
    sq_s = jnp.sum(psq_s, axis=0)[:, 0]
    sum_t = jnp.sum(psum_t, axis=0)[:, 0]
    sq_t = jnp.sum(psq_t, axis=0)[:, 0]
    inv_m = 1.0 / float(M)
    mean_s = sum_s * inv_m
    mean_t = sum_t * inv_m
    # Biased variance (module uses unbiased=False).
    # TODO(synk): E[x^2]-E[x]^2 can cancel when |mean| >> std; switch to a
    # shifted-sum/Welford variant if activations carry a large DC offset.
    var_s = jnp.maximum(sq_s * inv_m - mean_s * mean_s, 0.0)
    var_t = jnp.maximum(sq_t * inv_m - mean_t * mean_t, 0.0)

    def p(name):
        return params[name].astype(f32)

    rm_s = (1.0 - momentum) * p("running_mean_s") + momentum * mean_s
    rv_s = (1.0 - momentum) * p("running_var_s") + momentum * var_s
    rm_t = (1.0 - momentum) * p("running_mean_t") + momentum * mean_t
    rv_t = (1.0 - momentum) * p("running_var_t") + momentum * var_t

    g_s, b_s = p("gamma_s"), p("beta_s")
    g_t, b_t = p("gamma_t"), p("beta_t")
    ex_s = jnp.abs(g_s) < threshold
    ex_t = jnp.abs(g_t) < threshold

    def fold(exch, rm_own, rv_own, g_own, b_own, rm_oth, rv_oth, g_oth, b_oth):
        mean_u = jnp.where(exch, rm_oth, rm_own)
        var_u = jnp.where(exch, rv_oth, rv_own)
        g_u = jnp.where(exch, g_oth, g_own)
        b_u = jnp.where(exch, b_oth, b_own)
        scale = g_u / jnp.sqrt(var_u + eps)
        shift = b_u - mean_u * scale
        return scale.reshape(C, 1), shift.reshape(C, 1)

    scale_s, shift_s = fold(ex_s, rm_s, rv_s, g_s, b_s, rm_t, rv_t, g_t, b_t)
    scale_t, shift_t = fold(ex_t, rm_t, rv_t, g_t, b_t, rm_s, rv_s, g_s, b_s)

    # ---- normalize: out = x * scale + shift (dtype-preserving I/O) ----
    vec_spec = pl.BlockSpec((C, 1), lambda n, h: (0, 0))
    affine_cost = pl.CostEstimate(
        flops=2 * N * C * HW, transcendentals=0,
        bytes_accessed=2 * N * C * HW * elt + 2 * C * 4)
    norm_call = pl.pallas_call(
        _affine_kernel,
        out_shape=jax.ShapeDtypeStruct((N, C, HW), dtype),
        grid=(num_nb, num_hw),
        in_specs=[x_spec, vec_spec, vec_spec],
        out_specs=x_spec,
        compiler_params=pltpu.CompilerParams(
            dimension_semantics=("parallel", "parallel")),
        cost_estimate=affine_cost,
    )
    out_s = norm_call(xs3, scale_s, shift_s).reshape(N, C, H, W)
    out_t = norm_call(xt3, scale_t, shift_t).reshape(N, C, H, W)

    new_stats = {
        "running_mean_s": rm_s,
        "running_var_s": rv_s,
        "running_mean_t": rm_t,
        "running_var_t": rv_t,
    }
    return out_s, out_t, new_stats


def _reference_forward(x_s, x_t, params, *, threshold=0.5, momentum=0.1, eps=1e-5):
    """Plain-JAX reference mirroring the PyTorch module (training mode)."""
    def bcast(v):
        return v.reshape(1, -1, 1, 1)

    bm_s = jnp.mean(x_s, axis=(0, 2, 3))
    bv_s = jnp.var(x_s, axis=(0, 2, 3))
    bm_t = jnp.mean(x_t, axis=(0, 2, 3))
    bv_t = jnp.var(x_t, axis=(0, 2, 3))

    rm_s = (1 - momentum) * params["running_mean_s"] + momentum * bm_s
    rv_s = (1 - momentum) * params["running_var_s"] + momentum * bv_s
    rm_t = (1 - momentum) * params["running_mean_t"] + momentum * bm_t
    rv_t = (1 - momentum) * params["running_var_t"] + momentum * bv_t

    ex_s = jnp.abs(params["gamma_s"]) < threshold
    ex_t = jnp.abs(params["gamma_t"]) < threshold

    def norm(x, m, v, g, b):
        return bcast(g) * (x - bcast(m)) / jnp.sqrt(bcast(v) + eps) + bcast(b)

    own_s = norm(x_s, rm_s, rv_s, params["gamma_s"], params["beta_s"])
    swp_s = norm(x_s, rm_t, rv_t, params["gamma_t"], params["beta_t"])
    out_s = jnp.where(bcast(ex_s), swp_s, own_s)

    own_t = norm(x_t, rm_t, rv_t, params["gamma_t"], params["beta_t"])
    swp_t = norm(x_t, rm_s, rv_s, params["gamma_s"], params["beta_s"])
    out_t = jnp.where(bcast(ex_t), swp_t, own_t)
    return out_s, out_t, {"running_mean_s": rm_s, "running_var_s": rv_s,
                          "running_mean_t": rm_t, "running_var_t": rv_t}


if __name__ == "__main__":
    N, C, H, W = 2, 4, 16, 16
    key = jax.random.PRNGKey(0)
    k_xs, k_xt, k_gs, k_gt, k_bs, k_bt = jax.random.split(key, 6)

    x_s = jax.random.normal(k_xs, (N, C, H, W), dtype=jnp.float32)
    x_t = jax.random.normal(k_xt, (N, C, H, W), dtype=jnp.float32) * 1.5 + 0.3

    # Uniform gammas so both branches of the channel exchange are exercised.
    params = {
        "gamma_s": jax.random.uniform(k_gs, (C,), jnp.float32, 0.0, 1.0),
        "gamma_t": jax.random.uniform(k_gt, (C,), jnp.float32, 0.0, 1.0),
        "beta_s": 0.1 * jax.random.normal(k_bs, (C,), jnp.float32),
        "beta_t": 0.1 * jax.random.normal(k_bt, (C,), jnp.float32),
        "running_mean_s": jnp.zeros((C,), jnp.float32),
        "running_var_s": jnp.ones((C,), jnp.float32),
        "running_mean_t": jnp.zeros((C,), jnp.float32),
        "running_var_t": jnp.ones((C,), jnp.float32),
    }

    out_s, out_t, new_stats = interbn_forward(x_s, x_t, params)
    jax.block_until_ready((out_s, out_t, new_stats))

    ref_s, ref_t, ref_stats = _reference_forward(x_s, x_t, params)
    np.testing.assert_allclose(np.asarray(out_s), np.asarray(ref_s),
                               rtol=1e-5, atol=2e-5)
    np.testing.assert_allclose(np.asarray(out_t), np.asarray(ref_t),
                               rtol=1e-5, atol=2e-5)
    for k in new_stats:
        np.testing.assert_allclose(np.asarray(new_stats[k]),
                                   np.asarray(ref_stats[k]),
                                   rtol=1e-5, atol=2e-5)

    print("KERNEL_OK")
</pallas_src>

<mosaic_0001>
module attributes {stable_mosaic.version = 11 : i64} {
  func.func @_stats_kernel(%arg0: i32, %arg1: i32, %arg2: memref<2x4x256xf32, #tpu.memory_space<vmem>>, %arg3: memref<2x4x256xf32, #tpu.memory_space<vmem>>, %arg4: memref<1x4x1xf32, #tpu.memory_space<vmem>>, %arg5: memref<1x4x1xf32, #tpu.memory_space<vmem>>, %arg6: memref<1x4x1xf32, #tpu.memory_space<vmem>>, %arg7: memref<1x4x1xf32, #tpu.memory_space<vmem>>, %arg8: memref<4x128xf32, #tpu.memory_space<vmem>>, %arg9: memref<4x128xf32, #tpu.memory_space<vmem>>, %arg10: memref<4x128xf32, #tpu.memory_space<vmem>>, %arg11: memref<4x128xf32, #tpu.memory_space<vmem>>) attributes {dimension_semantics = [#tpu.dimension_semantics<parallel>, #tpu.dimension_semantics<arbitrary>], iteration_bounds = array<i64: 1, 1>, scalar_prefetch = 0 : i64, scratch_operands = 4 : i64, tpu.core_type = #tpu.core_type<tc>, window_params = [{transform_indices = @transform_0, window_bounds = array<i64: 2, 4, 256>}, {transform_indices = @transform_1, window_bounds = array<i64: 2, 4, 256>}, {transform_indices = @transform_2, window_bounds = array<i64: 1, 4, 1>}, {transform_indices = @transform_3, window_bounds = array<i64: 1, 4, 1>}, {transform_indices = @transform_4, window_bounds = array<i64: 1, 4, 1>}, {transform_indices = @transform_5, window_bounds = array<i64: 1, 4, 1>}]} {
    %c0_i32 = arith.constant 0 : i32
    %0 = arith.cmpi eq, %arg1, %c0_i32 : i32
    %1 = arith.extui %0 : i1 to i32
    %c0_i32_0 = arith.constant 0 : i32
    %2 = arith.cmpi ne, %1, %c0_i32_0 : i32
    scf.if %2 {
      %cst = arith.constant 0.000000e+00 : f32
      %78 = vector.broadcast %cst : f32 to vector<4x128xf32>
      %c0_88 = arith.constant 0 : index
      %c0_89 = arith.constant 0 : index
      %79 = vector.load %arg8[%c0_88, %c0_89] : memref<4x128xf32, #tpu.memory_space<vmem>>, vector<4x128xf32>
      tpu.vector_store %arg8[%c0_88, %c0_89], %78 {strides = array<i32>} : memref<4x128xf32, #tpu.memory_space<vmem>>, vector<4x128xf32>,
      %cst_90 = arith.constant 0.000000e+00 : f32
      %80 = vector.broadcast %cst_90 : f32 to vector<4x128xf32>
      %c0_91 = arith.constant 0 : index
      %c0_92 = arith.constant 0 : index
      %81 = vector.load %arg9[%c0_91, %c0_92] : memref<4x128xf32, #tpu.memory_space<vmem>>, vector<4x128xf32>
      tpu.vector_store %arg9[%c0_91, %c0_92], %80 {strides = array<i32>} : memref<4x128xf32, #tpu.memory_space<vmem>>, vector<4x128xf32>,
      %cst_93 = arith.constant 0.000000e+00 : f32
      %82 = vector.broadcast %cst_93 : f32 to vector<4x128xf32>
      %c0_94 = arith.constant 0 : index
      %c0_95 = arith.constant 0 : index
      %83 = vector.load %arg10[%c0_94, %c0_95] : memref<4x128xf32, #tpu.memory_space<vmem>>, vector<4x128xf32>
      tpu.vector_store %arg10[%c0_94, %c0_95], %82 {strides = array<i32>} : memref<4x128xf32, #tpu.memory_space<vmem>>, vector<4x128xf32>,
      %cst_96 = arith.constant 0.000000e+00 : f32
      %84 = vector.broadcast %cst_96 : f32 to vector<4x128xf32>
      %c0_97 = arith.constant 0 : index
      %c0_98 = arith.constant 0 : index
      %85 = vector.load %arg11[%c0_97, %c0_98] : memref<4x128xf32, #tpu.memory_space<vmem>>, vector<4x128xf32>
      tpu.vector_store %arg11[%c0_97, %c0_98], %84 {strides = array<i32>} : memref<4x128xf32, #tpu.memory_space<vmem>>, vector<4x128xf32>,
    } else {
    }
    %c0 = arith.constant 0 : index
    %c0_1 = arith.constant 0 : index
    %c0_2 = arith.constant 0 : index
    %3 = vector.load %arg2[%c0, %c0_1, %c0_2] : memref<2x4x256xf32, #tpu.memory_space<vmem>>, vector<1x4x128xf32>
    %4 = vector.shape_cast %3 : vector<1x4x128xf32> to vector<4x128xf32>
    %c0_3 = arith.constant 0 : index
    %c0_4 = arith.constant 0 : index
    %c0_5 = arith.constant 0 : index
    %5 = vector.load %arg3[%c0_3, %c0_4, %c0_5] : memref<2x4x256xf32, #tpu.memory_space<vmem>>, vector<1x4x128xf32>
    %6 = vector.shape_cast %5 : vector<1x4x128xf32> to vector<4x128xf32>
    %c0_6 = arith.constant 0 : index
    %c0_7 = arith.constant 0 : index
    %7 = vector.load %arg8[%c0_6, %c0_7] : memref<4x128xf32, #tpu.memory_space<vmem>>, vector<4x128xf32>
    %8 = arith.addf %7, %4 : vector<4x128xf32>
    %c0_8 = arith.constant 0 : index
    %c0_9 = arith.constant 0 : index
    %9 = vector.load %arg8[%c0_8, %c0_9] : memref<4x128xf32, #tpu.memory_space<vmem>>, vector<4x128xf32>
    tpu.vector_store %arg8[%c0_8, %c0_9], %8 {strides = array<i32>} : memref<4x128xf32, #tpu.memory_space<vmem>>, vector<4x128xf32>,
    %c0_10 = arith.constant 0 : index
    %c0_11 = arith.constant 0 : index
    %10 = vector.load %arg9[%c0_10, %c0_11] : memref<4x128xf32, #tpu.memory_space<vmem>>, vector<4x128xf32>
    %11 = arith.mulf %4, %4 : vector<4x128xf32>
    %12 = arith.addf %10, %11 : vector<4x128xf32>
    %c0_12 = arith.constant 0 : index
    %c0_13 = arith.constant 0 : index
    %13 = vector.load %arg9[%c0_12, %c0_13] : memref<4x128xf32, #tpu.memory_space<vmem>>, vector<4x128xf32>
    tpu.vector_store %arg9[%c0_12, %c0_13], %12 {strides = array<i32>} : memref<4x128xf32, #tpu.memory_space<vmem>>, vector<4x128xf32>,
    %c0_14 = arith.constant 0 : index
    %c0_15 = arith.constant 0 : index
    %14 = vector.load %arg10[%c0_14, %c0_15] : memref<4x128xf32, #tpu.memory_space<vmem>>, vector<4x128xf32>
    %15 = arith.addf %14, %6 : vector<4x128xf32>
    %c0_16 = arith.constant 0 : index
    %c0_17 = arith.constant 0 : index
    %16 = vector.load %arg10[%c0_16, %c0_17] : memref<4x128xf32, #tpu.memory_space<vmem>>, vector<4x128xf32>
    tpu.vector_store %arg10[%c0_16, %c0_17], %15 {strides = array<i32>} : memref<4x128xf32, #tpu.memory_space<vmem>>, vector<4x128xf32>,
    %c0_18 = arith.constant 0 : index
    %c0_19 = arith.constant 0 : index
    %17 = vector.load %arg11[%c0_18, %c0_19] : memref<4x128xf32, #tpu.memory_space<vmem>>, vector<4x128xf32>
    %18 = arith.mulf %6, %6 : vector<4x128xf32>
    %19 = arith.addf %17, %18 : vector<4x128xf32>
    %c0_20 = arith.constant 0 : index
    %c0_21 = arith.constant 0 : index
    %20 = vector.load %arg11[%c0_20, %c0_21] : memref<4x128xf32, #tpu.memory_space<vmem>>, vector<4x128xf32>
    tpu.vector_store %arg11[%c0_20, %c0_21], %19 {strides = array<i32>} : memref<4x128xf32, #tpu.memory_space<vmem>>, vector<4x128xf32>,
    %c1 = arith.constant 1 : index
    %c0_22 = arith.constant 0 : index
    %c0_23 = arith.constant 0 : index
    %21 = vector.load %arg2[%c1, %c0_22, %c0_23] : memref<2x4x256xf32, #tpu.memory_space<vmem>>, vector<1x4x128xf32>
    %22 = vector.shape_cast %21 : vector<1x4x128xf32> to vector<4x128xf32>
    %c1_24 = arith.constant 1 : index
    %c0_25 = arith.constant 0 : index
    %c0_26 = arith.constant 0 : index
    %23 = vector.load %arg3[%c1_24, %c0_25, %c0_26] : memref<2x4x256xf32, #tpu.memory_space<vmem>>, vector<1x4x128xf32>
    %24 = vector.shape_cast %23 : vector<1x4x128xf32> to vector<4x128xf32>
    %c0_27 = arith.constant 0 : index
    %c0_28 = arith.constant 0 : index
    %25 = vector.load %arg8[%c0_27, %c0_28] : memref<4x128xf32, #tpu.memory_space<vmem>>, vector<4x128xf32>
    %26 = arith.addf %25, %22 : vector<4x128xf32>
    %c0_29 = arith.constant 0 : index
    %c0_30 = arith.constant 0 : index
    %27 = vector.load %arg8[%c0_29, %c0_30] : memref<4x128xf32, #tpu.memory_space<vmem>>, vector<4x128xf32>
    tpu.vector_store %arg8[%c0_29, %c0_30], %26 {strides = array<i32>} : memref<4x128xf32, #tpu.memory_space<vmem>>, vector<4x128xf32>,
    %c0_31 = arith.constant 0 : index
    %c0_32 = arith.constant 0 : index
    %28 = vector.load %arg9[%c0_31, %c0_32] : memref<4x128xf32, #tpu.memory_space<vmem>>, vector<4x128xf32>
    %29 = arith.mulf %22, %22 : vector<4x128xf32>
    %30 = arith.addf %28, %29 : vector<4x128xf32>
    %c0_33 = arith.constant 0 : index
    %c0_34 = arith.constant 0 : index
    %31 = vector.load %arg9[%c0_33, %c0_34] : memref<4x128xf32, #tpu.memory_space<vmem>>, vector<4x128xf32>
    tpu.vector_store %arg9[%c0_33, %c0_34], %30 {strides = array<i32>} : memref<4x128xf32, #tpu.memory_space<vmem>>, vector<4x128xf32>,
    %c0_35 = arith.constant 0 : index
    %c0_36 = arith.constant 0 : index
    %32 = vector.load %arg10[%c0_35, %c0_36] : memref<4x128xf32, #tpu.memory_space<vmem>>, vector<4x128xf32>
    %33 = arith.addf %32, %24 : vector<4x128xf32>
    %c0_37 = arith.constant 0 : index
    %c0_38 = arith.constant 0 : index
    %34 = vector.load %arg10[%c0_37, %c0_38] : memref<4x128xf32, #tpu.memory_space<vmem>>, vector<4x128xf32>
    tpu.vector_store %arg10[%c0_37, %c0_38], %33 {strides = array<i32>} : memref<4x128xf32, #tpu.memory_space<vmem>>, vector<4x128xf32>,
    %c0_39 = arith.constant 0 : index
    %c0_40 = arith.constant 0 : index
    %35 = vector.load %arg11[%c0_39, %c0_40] : memref<4x128xf32, #tpu.memory_space<vmem>>, vector<4x128xf32>
    %36 = arith.mulf %24, %24 : vector<4x128xf32>
    %37 = arith.addf %35, %36 : vector<4x128xf32>
    %c0_41 = arith.constant 0 : index
    %c0_42 = arith.constant 0 : index
    %38 = vector.load %arg11[%c0_41, %c0_42] : memref<4x128xf32, #tpu.memory_space<vmem>>, vector<4x128xf32>
    tpu.vector_store %arg11[%c0_41, %c0_42], %37 {strides = array<i32>} : memref<4x128xf32, #tpu.memory_space<vmem>>, vector<4x128xf32>,
    %c0_43 = arith.constant 0 : index
    %c0_44 = arith.constant 0 : index
    %c128 = arith.constant 128 : index
    %39 = vector.load %arg2[%c0_43, %c0_44, %c128] : memref<2x4x256xf32, #tpu.memory_space<vmem>>, vector<1x4x128xf32>
    %40 = vector.shape_cast %39 : vector<1x4x128xf32> to vector<4x128xf32>
    %c0_45 = arith.constant 0 : index
    %c0_46 = arith.constant 0 : index
    %c128_47 = arith.constant 128 : index
    %41 = vector.load %arg3[%c0_45, %c0_46, %c128_47] : memref<2x4x256xf32, #tpu.memory_space<vmem>>, vector<1x4x128xf32>
    %42 = vector.shape_cast %41 : vector<1x4x128xf32> to vector<4x128xf32>
    %c0_48 = arith.constant 0 : index
    %c0_49 = arith.constant 0 : index
    %43 = vector.load %arg8[%c0_48, %c0_49] : memref<4x128xf32, #tpu.memory_space<vmem>>, vector<4x128xf32>
    %44 = arith.addf %43, %40 : vector<4x128xf32>
    %c0_50 = arith.constant 0 : index
    %c0_51 = arith.constant 0 : index
    %45 = vector.load %arg8[%c0_50, %c0_51] : memref<4x128xf32, #tpu.memory_space<vmem>>, vector<4x128xf32>
    tpu.vector_store %arg8[%c0_50, %c0_51], %44 {strides = array<i32>} : memref<4x128xf32, #tpu.memory_space<vmem>>, vector<4x128xf32>,
    %c0_52 = arith.constant 0 : index
    %c0_53 = arith.constant 0 : index
    %46 = vector.load %arg9[%c0_52, %c0_53] : memref<4x128xf32, #tpu.memory_space<vmem>>, vector<4x128xf32>
    %47 = arith.mulf %40, %40 : vector<4x128xf32>
    %48 = arith.addf %46, %47 : vector<4x128xf32>
    %c0_54 = arith.constant 0 : index
    %c0_55 = arith.constant 0 : index
    %49 = vector.load %arg9[%c0_54, %c0_55] : memref<4x128xf32, #tpu.memory_space<vmem>>, vector<4x128xf32>
    tpu.vector_store %arg9[%c0_54, %c0_55], %48 {strides = array<i32>} : memref<4x128xf32, #tpu.memory_space<vmem>>, vector<4x128xf32>,
    %c0_56 = arith.constant 0 : index
    %c0_57 = arith.constant 0 : index
    %50 = vector.load %arg10[%c0_56, %c0_57] : memref<4x128xf32, #tpu.memory_space<vmem>>, vector<4x128xf32>
    %51 = arith.addf %50, %42 : vector<4x128xf32>
    %c0_58 = arith.constant 0 : index
    %c0_59 = arith.constant 0 : index
    %52 = vector.load %arg10[%c0_58, %c0_59] : memref<4x128xf32, #tpu.memory_space<vmem>>, vector<4x128xf32>
    tpu.vector_store %arg10[%c0_58, %c0_59], %51 {strides = array<i32>} : memref<4x128xf32, #tpu.memory_space<vmem>>, vector<4x128xf32>,
    %c0_60 = arith.constant 0 : index
    %c0_61 = arith.constant 0 : index
    %53 = vector.load %arg11[%c0_60, %c0_61] : memref<4x128xf32, #tpu.memory_space<vmem>>, vector<4x128xf32>
    %54 = arith.mulf %42, %42 : vector<4x128xf32>
    %55 = arith.addf %53, %54 : vector<4x128xf32>
    %c0_62 = arith.constant 0 : index
    %c0_63 = arith.constant 0 : index
    %56 = vector.load %arg11[%c0_62, %c0_63] : memref<4x128xf32, #tpu.memory_space<vmem>>, vector<4x128xf32>
    tpu.vector_store %arg11[%c0_62, %c0_63], %55 {strides = array<i32>} : memref<4x128xf32, #tpu.memory_space<vmem>>, vector<4x128xf32>,
    %c1_64 = arith.constant 1 : index
    %c0_65 = arith.constant 0 : index
    %c128_66 = arith.constant 128 : index
    %57 = vector.load %arg2[%c1_64, %c0_65, %c128_66] : memref<2x4x256xf32, #tpu.memory_space<vmem>>, vector<1x4x128xf32>
    %58 = vector.shape_cast %57 : vector<1x4x128xf32> to vector<4x128xf32>
    %c1_67 = arith.constant 1 : index
    %c0_68 = arith.constant 0 : index
    %c128_69 = arith.constant 128 : index
    %59 = vector.load %arg3[%c1_67, %c0_68, %c128_69] : memref<2x4x256xf32, #tpu.memory_space<vmem>>, vector<1x4x128xf32>
    %60 = vector.shape_cast %59 : vector<1x4x128xf32> to vector<4x128xf32>
    %c0_70 = arith.constant 0 : index
    %c0_71 = arith.constant 0 : index
    %61 = vector.load %arg8[%c0_70, %c0_71] : memref<4x128xf32, #tpu.memory_space<vmem>>, vector<4x128xf32>
    %62 = arith.addf %61, %58 : vector<4x128xf32>
    %c0_72 = arith.constant 0 : index
    %c0_73 = arith.constant 0 : index
    %63 = vector.load %arg8[%c0_72, %c0_73] : memref<4x128xf32, #tpu.memory_space<vmem>>, vector<4x128xf32>
    tpu.vector_store %arg8[%c0_72, %c0_73], %62 {strides = array<i32>} : memref<4x128xf32, #tpu.memory_space<vmem>>, vector<4x128xf32>,
    %c0_74 = arith.constant 0 : index
    %c0_75 = arith.constant 0 : index
    %64 = vector.load %arg9[%c0_74, %c0_75] : memref<4x128xf32, #tpu.memory_space<vmem>>, vector<4x128xf32>
    %65 = arith.mulf %58, %58 : vector<4x128xf32>
    %66 = arith.addf %64, %65 : vector<4x128xf32>
    %c0_76 = arith.constant 0 : index
    %c0_77 = arith.constant 0 : index
    %67 = vector.load %arg9[%c0_76, %c0_77] : memref<4x128xf32, #tpu.memory_space<vmem>>, vector<4x128xf32>
    tpu.vector_store %arg9[%c0_76, %c0_77], %66 {strides = array<i32>} : memref<4x128xf32, #tpu.memory_space<vmem>>, vector<4x128xf32>,
    %c0_78 = arith.constant 0 : index
    %c0_79 = arith.constant 0 : index
    %68 = vector.load %arg10[%c0_78, %c0_79] : memref<4x128xf32, #tpu.memory_space<vmem>>, vector<4x128xf32>
    %69 = arith.addf %68, %60 : vector<4x128xf32>
    %c0_80 = arith.constant 0 : index
    %c0_81 = arith.constant 0 : index
    %70 = vector.load %arg10[%c0_80, %c0_81] : memref<4x128xf32, #tpu.memory_space<vmem>>, vector<4x128xf32>
    tpu.vector_store %arg10[%c0_80, %c0_81], %69 {strides = array<i32>} : memref<4x128xf32, #tpu.memory_space<vmem>>, vector<4x128xf32>,
    %c0_82 = arith.constant 0 : index
    %c0_83 = arith.constant 0 : index
    %71 = vector.load %arg11[%c0_82, %c0_83] : memref<4x128xf32, #tpu.memory_space<vmem>>, vector<4x128xf32>
    %72 = arith.mulf %60, %60 : vector<4x128xf32>
    %73 = arith.addf %71, %72 : vector<4x128xf32>
    %c0_84 = arith.constant 0 : index
    %c0_85 = arith.constant 0 : index
    %74 = vector.load %arg11[%c0_84, %c0_85] : memref<4x128xf32, #tpu.memory_space<vmem>>, vector<4x128xf32>
    tpu.vector_store %arg11[%c0_84, %c0_85], %73 {strides = array<i32>} : memref<4x128xf32, #tpu.memory_space<vmem>>, vector<4x128xf32>,
    %c0_i32_86 = arith.constant 0 : i32
    %75 = arith.cmpi eq, %arg1, %c0_i32_86 : i32
    %76 = arith.extui %75 : i1 to i32
    %c0_i32_87 = arith.constant 0 : i32
    %77 = arith.cmpi ne, %76, %c0_i32_87 : i32
    scf.if %77 {
      %c0_88 = arith.constant 0 : index
      %c0_89 = arith.constant 0 : index
      %78 = vector.load %arg8[%c0_88, %c0_89] : memref<4x128xf32, #tpu.memory_space<vmem>>, vector<4x128xf32>
      %cst = arith.constant dense<0.000000e+00> : vector<4xf32>
      %79 = vector.multi_reduction <add>, %78, %cst [1] : vector<4x128xf32> to vector<4xf32>
      %80 = vector.shape_cast %79 : vector<4xf32> to vector<4x1xf32>
      %c0_90 = arith.constant 0 : index
      %c0_91 = arith.constant 0 : index
      %c0_92 = arith.constant 0 : index
      %81 = vector.load %arg4[%c0_90, %c0_91, %c0_92] : memref<1x4x1xf32, #tpu.memory_space<vmem>>, vector<1x4x1xf32>
      %82 = vector.shape_cast %81 : vector<1x4x1xf32> to vector<4x1xf32>
      %83 = vector.shape_cast %80 : vector<4x1xf32> to vector<1x4x1xf32>
      tpu.vector_store %arg4[%c0_90, %c0_91, %c0_92], %83 {strides = array<i32>} : memref<1x4x1xf32, #tpu.memory_space<vmem>>, vector<1x4x1xf32>,
      %c0_93 = arith.constant 0 : index
      %c0_94 = arith.constant 0 : index
      %84 = vector.load %arg9[%c0_93, %c0_94] : memref<4x128xf32, #tpu.memory_space<vmem>>, vector<4x128xf32>
      %cst_95 = arith.constant dense<0.000000e+00> : vector<4xf32>
      %85 = vector.multi_reduction <add>, %84, %cst_95 [1] : vector<4x128xf32> to vector<4xf32>
      %86 = vector.shape_cast %85 : vector<4xf32> to vector<4x1xf32>
      %c0_96 = arith.constant 0 : index
      %c0_97 = arith.constant 0 : index
      %c0_98 = arith.constant 0 : index
      %87 = vector.load %arg5[%c0_96, %c0_97, %c0_98] : memref<1x4x1xf32, #tpu.memory_space<vmem>>, vector<1x4x1xf32>
      %88 = vector.shape_cast %87 : vector<1x4x1xf32> to vector<4x1xf32>
      %89 = vector.shape_cast %86 : vector<4x1xf32> to vector<1x4x1xf32>
      tpu.vector_store %arg5[%c0_96, %c0_97, %c0_98], %89 {strides = array<i32>} : memref<1x4x1xf32, #tpu.memory_space<vmem>>, vector<1x4x1xf32>,
      %c0_99 = arith.constant 0 : index
      %c0_100 = arith.constant 0 : index
      %90 = vector.load %arg10[%c0_99, %c0_100] : memref<4x128xf32, #tpu.memory_space<vmem>>, vector<4x128xf32>
      %cst_101 = arith.constant dense<0.000000e+00> : vector<4xf32>
      %91 = vector.multi_reduction <add>, %90, %cst_101 [1] : vector<4x128xf32> to vector<4xf32>
      %92 = vector.shape_cast %91 : vector<4xf32> to vector<4x1xf32>
      %c0_102 = arith.constant 0 : index
      %c0_103 = arith.constant 0 : index
      %c0_104 = arith.constant 0 : index
      %93 = vector.load %arg6[%c0_102, %c0_103, %c0_104] : memref<1x4x1xf32, #tpu.memory_space<vmem>>, vector<1x4x1xf32>
      %94 = vector.shape_cast %93 : vector<1x4x1xf32> to vector<4x1xf32>
      %95 = vector.shape_cast %92 : vector<4x1xf32> to vector<1x4x1xf32>
      tpu.vector_store %arg6[%c0_102, %c0_103, %c0_104], %95 {strides = array<i32>} : memref<1x4x1xf32, #tpu.memory_space<vmem>>, vector<1x4x1xf32>,
      %c0_105 = arith.constant 0 : index
      %c0_106 = arith.constant 0 : index
      %96 = vector.load %arg11[%c0_105, %c0_106] : memref<4x128xf32, #tpu.memory_space<vmem>>, vector<4x128xf32>
      %cst_107 = arith.constant dense<0.000000e+00> : vector<4xf32>
      %97 = vector.multi_reduction <add>, %96, %cst_107 [1] : vector<4x128xf32> to vector<4xf32>
      %98 = vector.shape_cast %97 : vector<4xf32> to vector<4x1xf32>
      %c0_108 = arith.constant 0 : index
      %c0_109 = arith.constant 0 : index
      %c0_110 = arith.constant 0 : index
      %99 = vector.load %arg7[%c0_108, %c0_109, %c0_110] : memref<1x4x1xf32, #tpu.memory_space<vmem>>, vector<1x4x1xf32>
      %100 = vector.shape_cast %99 : vector<1x4x1xf32> to vector<4x1xf32>
      %101 = vector.shape_cast %98 : vector<4x1xf32> to vector<1x4x1xf32>
      tpu.vector_store %arg7[%c0_108, %c0_109, %c0_110], %101 {strides = array<i32>} : memref<1x4x1xf32, #tpu.memory_space<vmem>>, vector<1x4x1xf32>,
    } else {
    }
    return
  }
  func.func @transform_0(%arg0: i32, %arg1: i32) -> (i32, i32, i32) {
    %c0_i32 = arith.constant 0 : i32
    %c0_i32_0 = arith.constant 0 : i32
    return %arg0, %c0_i32, %arg1 : i32, i32, i32
  }
  func.func @transform_1(%arg0: i32, %arg1: i32) -> (i32, i32, i32) {
    %c0_i32 = arith.constant 0 : i32
    %c0_i32_0 = arith.constant 0 : i32
    return %arg0, %c0_i32, %arg1 : i32, i32, i32
  }
  func.func @transform_2(%arg0: i32, %arg1: i32) -> (i32, i32, i32) {
    %c0_i32 = arith.constant 0 : i32
    %c0_i32_0 = arith.constant 0 : i32
    %c0_i32_1 = arith.constant 0 : i32
    return %arg0, %c0_i32, %c0_i32_0 : i32, i32, i32
  }
  func.func @transform_3(%arg0: i32, %arg1: i32) -> (i32, i32, i32) {
    %c0_i32 = arith.constant 0 : i32
    %c0_i32_0 = arith.constant 0 : i32
    %c0_i32_1 = arith.constant 0 : i32
    return %arg0, %c0_i32, %c0_i32_0 : i32, i32, i32
  }
  func.func @transform_4(%arg0: i32, %arg1: i32) -> (i32, i32, i32) {
    %c0_i32 = arith.constant 0 : i32
    %c0_i32_0 = arith.constant 0 : i32
    %c0_i32_1 = arith.constant 0 : i32
    return %arg0, %c0_i32, %c0_i32_0 : i32, i32, i32
  }
  func.func @transform_5(%arg0: i32, %arg1: i32) -> (i32, i32, i32) {
    %c0_i32 = arith.constant 0 : i32
    %c0_i32_0 = arith.constant 0 : i32
    %c0_i32_1 = arith.constant 0 : i32
    return %arg0, %c0_i32, %c0_i32_0 : i32, i32, i32
  }
}

</mosaic_0001>

<bundles_post_ra>
// kernel: tpu_custom_call.1
= control target key start
LH: loop header
LB: loop body
LE: loop exit
PB: predicated region body
PF: predicated region fallthrough
CT: control target
= control target key end

     0   :  { %11 = vsyncpa [#allocation7], 0  ;;  %s274_s0 = inlined_call_operand.hbm [shape: f32[2,4,256], index: 0, kind: input, shape index: {}]   ;;  %s275_s1 = inlined_call_operand.hbm [shape: f32[2,4,256], index: 1, kind: input, shape index: {}]   ;;  %s276_s2 = inlined_call_operand.vmem [shape: f32[1,4,1], index: 2, kind: output, shape index: {0}]   ;;  %s277_s3 = inlined_call_operand.vmem [shape: f32[1,4,1], index: 3, kind: output, shape index: {1}]   ;;  %s278_s4 = inlined_call_operand.vmem [shape: f32[1,4,1], index: 4, kind: output, shape index: {2}]   ;;  %s279_s5 = inlined_call_operand.vmem [shape: f32[1,4,1], index: 5, kind: output, shape index: {3}]  }
   0x1   :  { %s17_s20 = sshll.u32 %s274_s0, 4  ;;  %s18_s20 = int_to_ptr.hbm [resolvable:$true] %s17_s20 }
   0x2   :  { %12 = vsyncpa [#allocation9], 0  ;;  %s221_s21 = smov [#allocation6]   ;;  %s30_s25 = sshll.u32 %s275_s1, 4  ;;  %s31_s25 = int_to_ptr.hbm [resolvable:$true] %s30_s25 }
   0x3   :  { %s19_s22 = sshll.u32 %s221_s21, 4  ;;  %s222_s26 = smov 128   ;;  %s20_s22 = int_to_ptr.vmem [resolvable:$true] %s19_s22 }
   0x4   :  { %s223_s27 = smov 8   ;;  %s224_s28 = smov [#allocation8]  }
   0x5   :  { %25 = dma.hbm_to_vmem [thread:$0]  %s18_s20, 256, %s20_s22, [#allocation7], %s222_s26, %s222_s26, %s223_s27  }
   0x6   :  { %s32_s29 = sshll.u32 %s224_s28, 4  ;;  %s33_s29 = int_to_ptr.vmem [resolvable:$true] %s32_s29 }
   0x7   :  { %38 = dma.hbm_to_vmem [thread:$0]  %s31_s25, 256, %s33_s29, [#allocation9], %s222_s26, %s222_s26, %s223_s27  }
   0x8   :  { %217 = dma.done.wait [#allocation7], 256  }
   0x9   :  { %218 = vsyncadd [#allocation7], 4294967040 }
   0xa   :  { %219 = dma.done.wait [#allocation9], 256  }
   0xb   :  { %220 = vsyncadd [#allocation9], 4294967040  ;;  %v225_v0 = vmov 0.0   ;;  %v56_v1 = vld [vmem:[#allocation8] sm:$0xf]  ;;  %vm125_vm0 = vcmask 1043456  }
   0xc   :  { %53 = vst [vmem:[#allocation4] sm:$0xf] %v225_v0  ;;  %v68_v3 = vmul.f32 %v56_v1, %v56_v1  ;;  %v55_v4 = vld [vmem:[#allocation6] sm:$0xf]  ;;  %v74_v13 = vld [vmem:[#allocation8 + $0x8] sm:$0xf] }
   0xd   :  { %51 = vst [vmem:[#allocation2] sm:$0xf] %v225_v0  ;;  %v61_v7 = vmul.f32 %v55_v4, %v55_v4  ;;  %v72_v14 = vld [vmem:[#allocation6 + $0x8] sm:$0xf]  ;;  %v86_v17 = vmul.f32 %v74_v13, %v74_v13  ;;  %v90_v25 = vld [vmem:[#allocation8 + $0x4] sm:$0xf] }
   0xe   :  { %52 = vst [vmem:[#allocation3] sm:$0xf] %v225_v0  ;;  %v79_v15 = vmul.f32 %v72_v14, %v72_v14  ;;  %v89_v26 = vld [vmem:[#allocation6 + $0x4] sm:$0xf]  ;;  %v102_v29 = vmul.f32 %v90_v25, %v90_v25  ;;  %v106_v37 = vld [vmem:[#allocation8 + $0xc] sm:$0xf] }
   0xf   :  { %54 = vst [vmem:[#allocation5] sm:$0xf] %v225_v0  ;;  %v95_v27 = vmul.f32 %v89_v26, %v89_v26  ;;  %v105_v38 = vld [vmem:[#allocation6 + $0xc] sm:$0xf]  ;;  %v118_v41 = vmul.f32 %v106_v37, %v106_v37  ;;  %vm129_vm1 = vcmask 3072  }
  0x10   :  { %v111_v39 = vmul.f32 %v105_v38, %v105_v38 }
  0x13   :  { %v64_v2 = vld [vmem:[#allocation4] sm:$0xf] }
  0x14   :  { %v65_v5 = vadd.f32 %v64_v2, %v56_v1  ;;  %v57_v6 = vld [vmem:[#allocation2] sm:$0xf] }
  0x15   :  { %v58_v8 = vadd.f32 %v57_v6, %v55_v4  ;;  %v60_v9 = vld [vmem:[#allocation3] sm:$0xf] }
  0x16   :  { %66 = vst [vmem:[#allocation4] sm:$0xf] %v65_v5  ;;  %v67_v10 = vld [vmem:[#allocation5] sm:$0xf]  ;;  %v62_v11 = vadd.f32 %v61_v7, %v60_v9 }
  0x17   :  { %59 = vst [vmem:[#allocation2] sm:$0xf] %v58_v8  ;;  %v69_v12 = vadd.f32 %v68_v3, %v67_v10 }
  0x18   :  { %63 = vst [vmem:[#allocation3] sm:$0xf] %v62_v11 }
  0x19   :  { %70 = vst [vmem:[#allocation5] sm:$0xf] %v69_v12 }
  0x1d   :  { %v82_v16 = vld [vmem:[#allocation4] sm:$0xf] }
  0x1e   :  { %v83_v18 = vadd.f32 %v82_v16, %v74_v13  ;;  %v75_v19 = vld [vmem:[#allocation2] sm:$0xf] }
  0x1f   :  { %v76_v20 = vadd.f32 %v75_v19, %v72_v14  ;;  %v78_v21 = vld [vmem:[#allocation3] sm:$0xf] }
  0x20   :  { %84 = vst [vmem:[#allocation4] sm:$0xf] %v83_v18  ;;  %v85_v22 = vld [vmem:[#allocation5] sm:$0xf]  ;;  %v80_v23 = vadd.f32 %v79_v15, %v78_v21 }
  0x21   :  { %77 = vst [vmem:[#allocation2] sm:$0xf] %v76_v20  ;;  %v87_v24 = vadd.f32 %v86_v17, %v85_v22 }
  0x22   :  { %81 = vst [vmem:[#allocation3] sm:$0xf] %v80_v23 }
  0x23   :  { %88 = vst [vmem:[#allocation5] sm:$0xf] %v87_v24 }
  0x27   :  { %v98_v28 = vld [vmem:[#allocation4] sm:$0xf] }
  0x28   :  { %v99_v30 = vadd.f32 %v98_v28, %v90_v25  ;;  %v91_v31 = vld [vmem:[#allocation2] sm:$0xf] }
  0x29   :  { %v92_v32 = vadd.f32 %v91_v31, %v89_v26  ;;  %v94_v33 = vld [vmem:[#allocation3] sm:$0xf] }
  0x2a   :  { %100 = vst [vmem:[#allocation4] sm:$0xf] %v99_v30  ;;  %v101_v34 = vld [vmem:[#allocation5] sm:$0xf]  ;;  %v96_v35 = vadd.f32 %v95_v27, %v94_v33 }
  0x2b   :  { %93 = vst [vmem:[#allocation2] sm:$0xf] %v92_v32  ;;  %v103_v36 = vadd.f32 %v102_v29, %v101_v34 }
  0x2c   :  { %97 = vst [vmem:[#allocation3] sm:$0xf] %v96_v35 }
  0x2d   :  { %104 = vst [vmem:[#allocation5] sm:$0xf] %v103_v36 }
  0x31   :  { %v114_v40 = vld [vmem:[#allocation4] sm:$0xf] }
  0x32   :  { %v115_v42 = vadd.f32 %v114_v40, %v106_v37  ;;  %v107_v43 = vld [vmem:[#allocation2] sm:$0xf] }
  0x33   :  { %v108_v44 = vadd.f32 %v107_v43, %v105_v38  ;;  %v110_v45 = vld [vmem:[#allocation3] sm:$0xf] }
  0x34   :  { %116 = vst [vmem:[#allocation4] sm:$0xf] %v115_v42  ;;  %v117_v46 = vld [vmem:[#allocation5] sm:$0xf]  ;;  %v112_v47 = vadd.f32 %v111_v39, %v110_v45 }
  0x35   :  { %109 = vst [vmem:[#allocation2] sm:$0xf] %v108_v44  ;;  %v119_v48 = vadd.f32 %v118_v41, %v117_v46 }
  0x36   :  { %113 = vst [vmem:[#allocation3] sm:$0xf] %v112_v47 }
  0x37   :  { %120 = vst [vmem:[#allocation5] sm:$0xf] %v119_v48 }
  0x3b   :  { %v136_v49 = vld [vmem:[#allocation4] sm:$0xf] }
  0x3c   :  { %v137_v50 = vsel %vm125_vm0, %v136_v49, 0.0  ;;  %v124_v51 = vld [vmem:[#allocation2] sm:$0xf] }
  0x3d   :  { %138 = vadd.xlane.f32.xlu1 %v137_v50  ;;  %v126_v52 = vsel %vm125_vm0, %v124_v51, 0.0  ;;  %v131_v54 = vld [vmem:[#allocation3] sm:$0xf] }
  0x3e   :  { %127 = vadd.xlane.f32.xlu0 %v126_v52  ;;  %v141_v53 = vld [vmem:[#allocation5] sm:$0xf]  ;;  %v132_v56 = vsel %vm125_vm0, %v131_v54, 0.0 }
  0x3f   :  { %v142_v55 = vsel %vm125_vm0, %v141_v53, 0.0 }
  0x45   :  { %143 = vadd.xlane.f32.xlu1 %v142_v55 }
  0x46   :  { %133 = vadd.xlane.f32.xlu0 %v132_v56 }
  0xb0   :  { %v139_v57 = vpop.xlane.xlu1 %138 }
  0xb1   :  { %140 = vst.msk [vmem:[%s278_s4] sm:$0xf] %vm129_vm1, %v139_v57  ;;  %v128_v58 = vpop.xlane.xlu0 %127 }
  0xb2   :  { %130 = vst.msk [vmem:[%s276_s2] sm:$0xf] %vm129_vm1, %v128_v58 }
  0xb8   :  { %v144_v59 = vpop.xlane.xlu1 %143 }
  0xb9   :  { %145 = vst.msk [vmem:[%s279_s5] sm:$0xf] %vm129_vm1, %v144_v59  ;;  %v134_v60 = vpop.xlane.xlu0 %133 }
  0xba   :  { %135 = vst.msk [vmem:[%s277_s3] sm:$0xf] %vm129_vm1, %v134_v60 }
  0xbb   :  { %162 = vsyncpa [#allocation7], 1 }
  0xbc   :  { %163 = vsyncpa [#allocation9], 1 }

</bundles_post_ra>
